<compile_context>
chip_gen: v7x
topology: tpu7x:2x2x1
jax: 0.10.0
libtpu: 0.0.40
codegen_flags: <defaults>
</compile_context>

<pallas_src>
import functools

import numpy as np
import jax
import jax.numpy as jnp
from jax.experimental import pallas as pl
from jax.experimental.pallas import tpu as pltpu


# ---------------------------------------------------------------------------
# Pallas kernel: matmul -> GELU -> fused output matmul (pass-thru + reorder +
# de-norm + mask all pre-folded into Wx / Wh / b_out).
# ---------------------------------------------------------------------------
def export_kernel(x_ref, w1t_ref, b1_ref, wx_ref, wh_ref, bo_ref, out_ref, *,
                  nb, tn, chunk, gelu_dtype):
    w1t = w1t_ref[...]          # (hidden, C_in)    folded reorder + normalize
    b1 = b1_ref[...]            # (hidden, 1)
    wx = wx_ref[...]            # (C_total, C_in)   one-hot pass-thru selector
    wh = wh_ref[...]            # (C_total, hidden) folded de-norm + mask + reorder
    bo = bo_ref[...]            # (C_total, 1)

    for b in range(nb):                              # static, small batch block
        for c in range(0, tn, chunk):                # static lane chunks (<=1024)
            cl = min(chunk, tn - c)                  # multiple of 128
            x = x_ref[b, :, pl.ds(c, cl)]            # (C_in, cl) f32
            h = jnp.dot(w1t, x, preferred_element_type=jnp.float32) + b1
            h = jax.nn.gelu(h.astype(gelu_dtype), approximate=True)
            y = (jnp.dot(wh, h.astype(jnp.float32),
                         preferred_element_type=jnp.float32)
                 + jnp.dot(wx, x, preferred_element_type=jnp.float32)
                 + bo)                               # (C_total, cl)
            # single aligned, lane-dense, unmasked store
            out_ref[b, :, pl.ds(c, cl)] = y.astype(out_ref.dtype)


# ---------------------------------------------------------------------------
# Tile selection: maximize per-step HBM traffic within a VMEM budget.
# ---------------------------------------------------------------------------
def _choose_tiles(B, HW_pad, C_in, C_total, hidden, vmem_budget,
                  target_step_bytes=2 << 20):
    m = HW_pad // 128
    divs = [128 * d for d in range(1, m + 1) if m % d == 0]   # ascending

    def vmem_bytes(nb, tn):
        io = 2 * 4 * nb * (C_in + C_total) * tn               # double-buffered tiles
        inter = 4 * (C_in + hidden + C_total) * min(tn, 1024) # live compute chunk
        w = 2 * 4 * (hidden * (C_in + 1) + C_total * (C_in + hidden + 1))
        return io + inter + w

    def step_bytes(nb, tn):
        return 4 * nb * (C_in + C_total) * tn

    tn = divs[0]
    for cand in divs:                                          # largest tn in budget
        if vmem_bytes(1, cand) <= vmem_budget:
            tn = cand

    nb = 1
    for cand in range(1, B + 1):                               # grow batch block
        if B % cand == 0 and vmem_bytes(cand, tn) <= vmem_budget:
            nb = cand
            if step_bytes(cand, tn) >= target_step_bytes:
                break

    # v7x has 2 TensorCores: keep >= 2 grid steps when the problem allows it.
    while (B // nb) * (HW_pad // tn) < 2:
        if nb > 1:
            nb = max(d for d in range(1, nb) if B % d == 0)
        else:
            smaller = [d for d in divs if d < tn]
            if not smaller:
                break
            tn = smaller[-1]
    return nb, tn


def _gelu_dtype_for_device():
    """bf16 GELU intermediate on bf16-capable VPU/EUP (v6e/v7x); f32 elsewhere."""
    try:
        kind = jax.devices()[0].device_kind.lower()
    except Exception:
        return jnp.float32
    if ("v6" in kind) or ("v7" in kind) or ("7x" in kind):
        return jnp.bfloat16
    return jnp.float32


# ---------------------------------------------------------------------------
# Wrapper: trace-time weight folding + pallas_call on the NCHW-native layout.
# ---------------------------------------------------------------------------
def model_for_export_forward(x_nchw, params, *, gelu_dtype=None):
    """x_nchw: (B, C_in, H, W) float32.  Returns (B, len(output_order), H, W)."""
    if gelu_dtype is None:
        gelu_dtype = _gelu_dtype_for_device()

    B, C_in, H, W = x_nchw.shape
    HW = H * W
    hidden = params["w1"].shape[1]
    C_out = params["w2"].shape[1]

    # Static channel permutations (module buffers) — enable the weight folds.
    input_order = tuple(int(i) for i in np.asarray(params["input_order"]))
    output_order = tuple(int(i) for i in np.asarray(params["output_order"]))
    assert sorted(input_order) == list(range(C_in)), "input_order must be a permutation"
    C_total = len(output_order)

    # ---- Fold input reorder + input_normalize into w1 / b1 -----------------
    in_mean = params["in_mean"].reshape(C_in)
    in_std = params["in_std"].reshape(C_in)
    w1 = params["w1"]                                   # (C_in, hidden), rows in reordered space
    b1 = params["b1"].reshape(hidden)
    w1_scaled = w1 / in_std[:, None]
    b1_eff = b1 - (in_mean / in_std) @ w1
    inv_order = np.argsort(np.asarray(input_order))     # w1_eff[orig_ch] = w1_scaled[reordered_ch]
    w1_eff = w1_scaled[inv_order, :]                    # rows in ORIGINAL channel space
    w1t = w1_eff.T                                      # (hidden, C_in)
    b1_col = b1_eff[:, None]                            # (hidden, 1)

    # ---- Fold output de-normalize + zero mask into w2 / b2 -----------------
    out_mean = params["out_mean"].reshape(C_out)
    out_std = params["out_std"].reshape(C_out)
    zero_mask = params["zero_mask"].reshape(C_out)
    keep = (zero_mask == 0).astype(params["w2"].dtype)  # masked -> exactly 0
    w2t_eff = (params["w2"] * (out_std * keep)[None, :]).T        # (C_out, hidden)
    b2_eff = (params["b2"].reshape(C_out) * out_std + out_mean) * keep

    # ---- Fold pass-thru concat + output reorder into Wx / Wh / b_out -------
    wx = jnp.zeros((C_total, C_in), jnp.float32)        # one-hot x selectors
    wh = jnp.zeros((C_total, hidden), jnp.float32)      # w2 rows in final order
    bo = jnp.zeros((C_total,), jnp.float32)
    for t, src in enumerate(output_order):
        if src < C_in:                                  # pass-thru reordered-x channel src
            wx = wx.at[t, input_order[src]].set(1.0)    # = original channel input_order[src]
        else:
            j = src - C_in
            wh = wh.at[t].set(w2t_eff[j])
            bo = bo.at[t].set(b2_eff[j])
    bo_col = bo[:, None]                                # (C_total, 1)

    # ---- Lane padding (keeps stores unmasked) + tile selection --------------
    HW_pad = ((HW + 127) // 128) * 128
    x3 = x_nchw.reshape(B, C_in, HW)
    if HW_pad != HW:
        x3 = jnp.pad(x3, ((0, 0), (0, 0), (0, HW_pad - HW)))

    try:
        vmem_phys = int(getattr(pltpu.get_tpu_info(), "vmem_capacity_bytes", 0)) or (64 << 20)
    except Exception:
        vmem_phys = 64 << 20                            # conservative (v7x per-TC)
    vmem_budget = int(vmem_phys * 0.45)
    vmem_limit = max(32 << 20, int(vmem_phys * 0.7))

    nb, tn = _choose_tiles(B, HW_pad, C_in, C_total, hidden, vmem_budget)
    chunk = min(tn, 1024)                               # bound vreg live ranges
    kernel = functools.partial(export_kernel, nb=nb, tn=tn, chunk=chunk,
                               gelu_dtype=gelu_dtype)

    flops = 2 * B * HW_pad * (C_in * hidden + hidden * C_total + C_in * C_total)
    bytes_accessed = 4 * (B * (C_in + C_total) * HW_pad
                          + hidden * (C_in + 1) + C_total * (C_in + hidden + 1))

    y3 = pl.pallas_call(
        kernel,
        out_shape=jax.ShapeDtypeStruct((B, C_total, HW_pad), jnp.float32),
        grid_spec=pltpu.PrefetchScalarGridSpec(
            num_scalar_prefetch=0,
            grid=(B // nb, HW_pad // tn),
            in_specs=[
                pl.BlockSpec((nb, C_in, tn), lambda b, j: (b, 0, j)),     # x
                pl.BlockSpec((hidden, C_in), lambda b, j: (0, 0)),        # folded w1^T
                pl.BlockSpec((hidden, 1), lambda b, j: (0, 0)),           # folded b1
                pl.BlockSpec((C_total, C_in), lambda b, j: (0, 0)),       # pass-thru selector
                pl.BlockSpec((C_total, hidden), lambda b, j: (0, 0)),     # folded w2^T (reordered/masked)
                pl.BlockSpec((C_total, 1), lambda b, j: (0, 0)),          # folded output bias
            ],
            out_specs=pl.BlockSpec((nb, C_total, tn), lambda b, j: (b, 0, j)),
        ),
        compiler_params=pltpu.CompilerParams(
            dimension_semantics=("parallel", "parallel"),
            vmem_limit_bytes=vmem_limit),
        cost_estimate=pl.CostEstimate(
            flops=flops,
            transcendentals=B * HW_pad * hidden,
            bytes_accessed=bytes_accessed),
    )(x3, w1t, b1_col, wx, wh, bo_col)

    # TODO(synk): if accuracy allows, cast x3/out to bfloat16 end-to-end for ~2x
    # on the HBM-bound roofline (kept f32 here to preserve export numerics).
    return y3[:, :, :HW].reshape(B, C_total, H, W)


# ---------------------------------------------------------------------------
# Pure-JAX reference: the un-folded module math (gather, normalize, MLP,
# de-normalize, mask, concat, reorder), for a correctness check.
# ---------------------------------------------------------------------------
def reference_forward(x_nchw, params):
    input_order = jnp.asarray(np.asarray(params["input_order"]))
    output_order = jnp.asarray(np.asarray(params["output_order"]))
    x_r = x_nchw[:, input_order, :, :]
    B, C_in, H, W = x_r.shape
    x_flat = jnp.transpose(x_r, (0, 2, 3, 1)).reshape(-1, C_in)
    x_norm = (x_flat - params["in_mean"]) / params["in_std"]
    h = jax.nn.gelu(x_norm @ params["w1"] + params["b1"], approximate=True)
    y = h @ params["w2"] + params["b2"]
    y = y * params["out_std"] + params["out_mean"]
    y = jnp.where(params["zero_mask"] > 0, 0.0, y)
    C_out = y.shape[-1]
    y_nchw = jnp.transpose(y.reshape(B, H, W, C_out), (0, 3, 1, 2))
    y_cat = jnp.concatenate([x_r, y_nchw], axis=1)
    return y_cat[:, output_order, :, :]


# ---------------------------------------------------------------------------
# Deterministic parameter construction (shapes implied by the module).
# ---------------------------------------------------------------------------
def make_params(key, C_in, hidden, C_out):
    ks = jax.random.split(key, 8)
    params = {
        # input_normalize / output_normalize buffers (per-channel affine)
        "in_mean":  jax.random.normal(ks[0], (1, C_in), jnp.float32),
        "in_std":   jax.random.uniform(ks[1], (1, C_in), jnp.float32, 0.5, 1.5),
        "out_mean": jax.random.normal(ks[2], (1, C_out), jnp.float32),
        "out_std":  jax.random.uniform(ks[3], (1, C_out), jnp.float32, 0.5, 1.5),
        # self.model weights: 1x1 conv -> GELU -> 1x1 conv (stand-in network)
        "w1": jax.random.normal(ks[4], (C_in, hidden), jnp.float32) * 0.2,
        "b1": jax.random.normal(ks[5], (1, hidden), jnp.float32) * 0.1,
        "w2": jax.random.normal(ks[6], (hidden, C_out), jnp.float32) * 0.2,
        "b2": jax.random.normal(ks[7], (1, C_out), jnp.float32) * 0.1,
    }
    # zero_output buffer: loss_output_weights[None, :] == 0  (channels 2 and 5)
    zero_mask = jnp.zeros((1, C_out), jnp.float32).at[0, 2].set(1.0).at[0, 5].set(1.0)
    params["zero_mask"] = zero_mask
    # input_order / output_order buffers: STATIC permutations (numpy, not traced)
    params["input_order"] = np.array([(i * 3) % C_in for i in range(C_in)], np.int32)
    # two pass-thru input channels followed by all model output channels
    params["output_order"] = np.array([0, 3] + [C_in + j for j in range(C_out)], np.int32)
    return params


if __name__ == "__main__":
    B, C_in, H, W = 2, 8, 16, 16
    hidden, C_out = 32, 8

    key = jax.random.PRNGKey(0)
    k_x, k_p = jax.random.split(key)
    x = jax.random.normal(k_x, (B, C_in, H, W), jnp.float32)
    params = make_params(k_p, C_in, hidden, C_out)

    gelu_dtype = _gelu_dtype_for_device()
    y = model_for_export_forward(x, params, gelu_dtype=gelu_dtype)
    y = jax.block_until_ready(y)

    y_ref = reference_forward(x, params)
    tol = 5e-2 if gelu_dtype == jnp.bfloat16 else 1e-4
    assert y.shape == (B, 2 + C_out, H, W), y.shape
    assert jnp.allclose(y, y_ref, atol=tol, rtol=tol), "mismatch vs reference"
    # masked output channels must be exactly zero (mask folded into Wh / b_out)
    assert float(jnp.abs(y[:, 2 + 2]).max()) == 0.0
    assert float(jnp.abs(y[:, 2 + 5]).max()) == 0.0

    print("KERNEL_OK")
</pallas_src>

<mosaic_0001>
module attributes {stable_mosaic.version = 11 : i64} {
  func.func @export_kernel(%arg0: i32, %arg1: i32, %arg2: memref<1x8x256xf32, #tpu.memory_space<vmem>>, %arg3: memref<32x8xf32, #tpu.memory_space<vmem>>, %arg4: memref<32x1xf32, #tpu.memory_space<vmem>>, %arg5: memref<10x8xf32, #tpu.memory_space<vmem>>, %arg6: memref<10x32xf32, #tpu.memory_space<vmem>>, %arg7: memref<10x1xf32, #tpu.memory_space<vmem>>, %arg8: memref<1x10x256xf32, #tpu.memory_space<vmem>>) attributes {dimension_semantics = [#tpu.dimension_semantics<parallel>, #tpu.dimension_semantics<parallel>], iteration_bounds = array<i64: 2, 1>, scalar_prefetch = 0 : i64, scratch_operands = 0 : i64, tpu.core_type = #tpu.core_type<tc>, window_params = [{transform_indices = @transform_0, window_bounds = array<i64: 1, 8, 256>}, {pipeline_mode = #tpu.pipeline_mode<synchronous>, transform_indices = @transform_1, window_bounds = array<i64: 32, 8>}, {pipeline_mode = #tpu.pipeline_mode<synchronous>, transform_indices = @transform_2, window_bounds = array<i64: 32, 1>}, {pipeline_mode = #tpu.pipeline_mode<synchronous>, transform_indices = @transform_3, window_bounds = array<i64: 10, 8>}, {pipeline_mode = #tpu.pipeline_mode<synchronous>, transform_indices = @transform_4, window_bounds = array<i64: 10, 32>}, {pipeline_mode = #tpu.pipeline_mode<synchronous>, transform_indices = @transform_5, window_bounds = array<i64: 10, 1>}, {transform_indices = @transform_6, window_bounds = array<i64: 1, 10, 256>}]} {
    %c0 = arith.constant 0 : index
    %c0_0 = arith.constant 0 : index
    %0 = vector.load %arg3[%c0, %c0_0] : memref<32x8xf32, #tpu.memory_space<vmem>>, vector<32x8xf32>
    %c0_1 = arith.constant 0 : index
    %c0_2 = arith.constant 0 : index
    %1 = vector.load %arg4[%c0_1, %c0_2] : memref<32x1xf32, #tpu.memory_space<vmem>>, vector<32x1xf32>
    %c0_3 = arith.constant 0 : index
    %c0_4 = arith.constant 0 : index
    %2 = vector.load %arg5[%c0_3, %c0_4] : memref<10x8xf32, #tpu.memory_space<vmem>>, vector<10x8xf32>
    %c0_5 = arith.constant 0 : index
    %c0_6 = arith.constant 0 : index
    %3 = vector.load %arg6[%c0_5, %c0_6] : memref<10x32xf32, #tpu.memory_space<vmem>>, vector<10x32xf32>
    %c0_7 = arith.constant 0 : index
    %c0_8 = arith.constant 0 : index
    %4 = vector.load %arg7[%c0_7, %c0_8] : memref<10x1xf32, #tpu.memory_space<vmem>>, vector<10x1xf32>
    %c0_9 = arith.constant 0 : index
    %c0_10 = arith.constant 0 : index
    %c0_11 = arith.constant 0 : index
    %5 = vector.load %arg2[%c0_9, %c0_10, %c0_11] : memref<1x8x256xf32, #tpu.memory_space<vmem>>, vector<1x8x256xf32>
    %6 = vector.shape_cast %5 : vector<1x8x256xf32> to vector<8x256xf32>
    %cst = arith.constant dense<0.000000e+00> : vector<32x256xf32>
    %7 = tpu.matmul %0, %6, %cst {dimension_numbers = #tpu.dot_dimension_numbers<[1], [0], [0], [1], [0, 0, 1, 1], [], []>} : vector<32x8xf32>, vector<8x256xf32>, vector<32x256xf32> -> vector<32x256xf32>
    %8 = vector.broadcast %1 : vector<32x1xf32> to vector<32x256xf32>
    %9 = arith.addf %7, %8 : vector<32x256xf32>
    %10 = arith.mulf %9, %9 : vector<32x256xf32>
    %11 = arith.mulf %9, %10 : vector<32x256xf32>
    %cst_12 = arith.constant 4.471500e-02 : f32
    %12 = vector.broadcast %cst_12 : f32 to vector<32x256xf32>
    %13 = arith.mulf %12, %11 : vector<32x256xf32>
    %14 = arith.addf %9, %13 : vector<32x256xf32>
    %cst_13 = arith.constant 0.797884583 : f32
    %15 = vector.broadcast %cst_13 : f32 to vector<32x256xf32>
    %16 = arith.mulf %15, %14 : vector<32x256xf32>
    %17 = math.tanh %16 : vector<32x256xf32>
    %cst_14 = arith.constant 1.000000e+00 : f32
    %18 = vector.broadcast %cst_14 : f32 to vector<32x256xf32>
    %19 = arith.addf %18, %17 : vector<32x256xf32>
    %cst_15 = arith.constant 5.000000e-01 : f32
    %20 = vector.broadcast %cst_15 : f32 to vector<32x256xf32>
    %21 = arith.mulf %20, %19 : vector<32x256xf32>
    %22 = arith.mulf %9, %21 : vector<32x256xf32>
    %cst_16 = arith.constant dense<0.000000e+00> : vector<10x256xf32>
    %23 = tpu.matmul %3, %22, %cst_16 {dimension_numbers = #tpu.dot_dimension_numbers<[1], [0], [0], [1], [0, 0, 1, 1], [], []>} : vector<10x32xf32>, vector<32x256xf32>, vector<10x256xf32> -> vector<10x256xf32>
    %cst_17 = arith.constant dense<0.000000e+00> : vector<10x256xf32>
    %24 = tpu.matmul %2, %6, %cst_17 {dimension_numbers = #tpu.dot_dimension_numbers<[1], [0], [0], [1], [0, 0, 1, 1], [], []>} : vector<10x8xf32>, vector<8x256xf32>, vector<10x256xf32> -> vector<10x256xf32>
    %25 = arith.addf %23, %24 : vector<10x256xf32>
    %26 = vector.broadcast %4 : vector<10x1xf32> to vector<10x256xf32>
    %27 = arith.addf %25, %26 : vector<10x256xf32>
    %c0_18 = arith.constant 0 : index
    %c0_19 = arith.constant 0 : index
    %c0_20 = arith.constant 0 : index
    %28 = vector.load %arg8[%c0_18, %c0_19, %c0_20] : memref<1x10x256xf32, #tpu.memory_space<vmem>>, vector<1x10x256xf32>
    %29 = vector.shape_cast %28 : vector<1x10x256xf32> to vector<10x256xf32>
    %30 = vector.shape_cast %27 : vector<10x256xf32> to vector<1x10x256xf32>
    tpu.vector_store %arg8[%c0_18, %c0_19, %c0_20], %30 {strides = array<i32>} : memref<1x10x256xf32, #tpu.memory_space<vmem>>, vector<1x10x256xf32>,
    return
  }
  func.func @transform_0(%arg0: i32, %arg1: i32) -> (i32, i32, i32) {
    %c0_i32 = arith.constant 0 : i32
    %c0_i32_0 = arith.constant 0 : i32
    return %arg0, %c0_i32, %arg1 : i32, i32, i32
  }
  func.func @transform_1(%arg0: i32, %arg1: i32) -> (i32, i32) {
    %c0_i32 = arith.constant 0 : i32
    %c0_i32_0 = arith.constant 0 : i32
    %c0_i32_1 = arith.constant 0 : i32
    return %c0_i32, %c0_i32_0 : i32, i32
  }
  func.func @transform_2(%arg0: i32, %arg1: i32) -> (i32, i32) {
    %c0_i32 = arith.constant 0 : i32
    %c0_i32_0 = arith.constant 0 : i32
    %c0_i32_1 = arith.constant 0 : i32
    return %c0_i32, %c0_i32_0 : i32, i32
  }
  func.func @transform_3(%arg0: i32, %arg1: i32) -> (i32, i32) {
    %c0_i32 = arith.constant 0 : i32
    %c0_i32_0 = arith.constant 0 : i32
    %c0_i32_1 = arith.constant 0 : i32
    return %c0_i32, %c0_i32_0 : i32, i32
  }
  func.func @transform_4(%arg0: i32, %arg1: i32) -> (i32, i32) {
    %c0_i32 = arith.constant 0 : i32
    %c0_i32_0 = arith.constant 0 : i32
    %c0_i32_1 = arith.constant 0 : i32
    return %c0_i32, %c0_i32_0 : i32, i32
  }
  func.func @transform_5(%arg0: i32, %arg1: i32) -> (i32, i32) {
    %c0_i32 = arith.constant 0 : i32
    %c0_i32_0 = arith.constant 0 : i32
    %c0_i32_1 = arith.constant 0 : i32
    return %c0_i32, %c0_i32_0 : i32, i32
  }
  func.func @transform_6(%arg0: i32, %arg1: i32) -> (i32, i32, i32) {
    %c0_i32 = arith.constant 0 : i32
    %c0_i32_0 = arith.constant 0 : i32
    return %arg0, %c0_i32, %arg1 : i32, i32, i32
  }
}

</mosaic_0001>

<bundles_post_ra>
// kernel: tpu_custom_call.1
= control target key start
LH: loop header
LB: loop body
LE: loop exit
PB: predicated region body
PF: predicated region fallthrough
CT: control target
= control target key end

     0   :  { %s911_s21 = smov 0   ;;  %s913_s22 = smov 0   ;;  %s1053_s0 = inlined_call_operand.vmem [shape: f32[2,8,256], index: 0, kind: input, shape index: {}]   ;;  %s1054_s1 = inlined_call_operand.vmem [shape: f32[32,8], index: 1, kind: input, shape index: {}]   ;;  %s1055_s2 = inlined_call_operand.vmem [shape: f32[32,1], index: 2, kind: input, shape index: {}]   ;;  %s1056_s3 = inlined_call_operand.vmem [shape: f32[10,8], index: 3, kind: input, shape index: {}]   ;;  %s1057_s4 = inlined_call_operand.vmem [shape: f32[10,32], index: 4, kind: input, shape index: {}]   ;;  %s1058_s5 = inlined_call_operand.vmem [shape: f32[10,1], index: 5, kind: input, shape index: {}]   ;;  %s1059_s6 = inlined_call_operand.vmem [shape: f32[2,10,256], index: 6, kind: output, shape index: {}]  }
   0x1   :  { %s915_s23 = smov 0  }
   0x2 LB: > { %s28_s24 = sadd.s32 1, %s868_s22  ;;  %p777_p0 = scmp.ge.s32.totalorder %s872_s23, 1  ;;  %s872_s23 = sphi %s915_s23, %s16_s23   ;;  %s868_s22 = sphi %s913_s22, %s1061_s22   ;;  %s864_s21 = sphi %s911_s21, %s1060_s21  }
   0x3   : > { %p30_p1 = scmp.ge.s32.totalorder %s28_s24, 2  ;;  %p233_p2 = scmp.lt.s32.totalorder %s872_s23, 3 }
   0x5   : > { %s1063_s24 = smov (%p30_p1, %s28_s24), 0  ;;  %p234_p3 = pnand %p777_p0, %p233_p2 }
   0x6   : > { %p272_p4 = scmp.lt.s32.totalorder (!%p234_p3), %s864_s21, 1  ;;  %v874_v0 = vmov (!%p234_p3), 0.0   ;;  %v295_v1 = vld [vmem:[%s1055_s2] sm:$0xff] (!%p234_p3)  ;;  %v297_v2 = vld [vmem:[%s1055_s2 + $0x10] sm:$0xff] (!%p234_p3)  ;;  %v875_v3 = vmov (!%p234_p3), 0   ;;  %v296_v4 = vld [vmem:[%s1055_s2 + $0x8] sm:$0xff] (!%p234_p3) }
   0x7   : > { %237 = sbr.rel (%p234_p3) target bundleno = 500 (0x1f4), region = 44  ;;  %404 = vmatprep.mubr.f32.mxu0 (!%p234_p3), %v874_v0  ;;  %571 = vmatprep.mubr.f32.mxu1 (!%p234_p3), %v874_v0  ;;  %v298_v5 = vld [vmem:[%s1055_s2 + $0x18] sm:$0xff] (!%p234_p3)  ;;  %v291_v8 = vld [vmem:[%s1054_s1] sm:$0xff] (!%p234_p3)  ;;  %vm327_vm0 = vcmask (!%p234_p3), 64512   ;;  %v304_v10 = vld [vmem:[%s1058_s5 + $0x8] sm:$0x3] (!%p234_p3) }
   0x8   : > { %832 = vset.pattern.permute.xlu0 (!%p234_p3), %v875_v3  ;;  %833 = vset.pattern.permute.xlu1 (!%p234_p3), %v875_v3  ;;  %v303_v9 = vld [vmem:[%s1058_s5] sm:$0xff] (!%p234_p3)  ;;  %v292_v11 = vld [vmem:[%s1054_s1 + $0x8] sm:$0xff] (!%p234_p3)  ;;  %v293_v12 = vld [vmem:[%s1054_s1 + $0x10] sm:$0xff] (!%p234_p3)  ;;  %vm584_vm1 = vcmask (!%p234_p3), 261120  }
   0x9   : > { %309 = vperm.xlu0 (!%p234_p3), %832, %v295_v1   ;;  %319 = vperm.xlu1 (!%p234_p3), %833, %v297_v2   ;;  %v294_v13 = vld [vmem:[%s1054_s1 + $0x18] sm:$0xff] (!%p234_p3)  ;;  %v299_v14 = vld [vmem:[%s1056_s3] sm:$0xff] (!%p234_p3)  ;;  %v300_v15 = vld [vmem:[%s1056_s3 + $0x8] sm:$0x3] (!%p234_p3) }
   0xd   : > { %314 = vperm.xlu0 (!%p234_p3), %832, %v296_v4   ;;  %324 = vperm.xlu1 (!%p234_p3), %833, %v298_v5  }
   0xe   : > { %s1065_s21 = smov (!%p272_p4, %s864_s21), 1 }
   0xf   : > { %s792_s29 = sshll.u32 %s1065_s21, 4  ;;  %s793_s13 = sshll.u32 %s1065_s21, 5 }
  0x10   : > { %s279_s10 = scalar_lea.vmem %s1053_s0, %s792_s29  ;;  %s289_s16 = scalar_lea.vmem %s1059_s6, %s793_s13 }
  0x11   : > { %v306_v6 = vld [vmem:[%s279_s10 + $0x8] sm:$0xff]  ;;  %v305_v7 = vld [vmem:[%s279_s10] sm:$0xff]  ;;  %670 = vperm.xlu0 %832, %v303_v9   ;;  %675 = vperm.xlu1 %833, %v304_v10  }
  0x12   : > { %340 = vmatprep.subr.mxu0 %v306_v6  ;;  %507 = vmatprep.subr.mxu1 %v306_v6 }
  0x13   : > { %341 = vmatpush1.msra.mxu0 %v305_v7  ;;  %508 = vmatpush1.msra.mxu1 %v305_v7 }
  0x14   : > { %782 = vmatmul.mubr.msk.f32.vlgmr.msra.gmra.mrb[0].mxu0 %vm327_vm0, %v291_v8  ;;  %786 = vmatmul.mubr.msk.f32.vlgmr.msra.gmra.mrb[0].mxu1 %vm327_vm0, %v299_v14 }
  0x15   : > { %410 = vmatprep.mubr.f32.mxu0 %v874_v0  ;;  %577 = vmatprep.mubr.f32.mxu1 %v874_v0 }
  0x18   : > { %783 = vmatmul.mubr.msk.f32.gmra.mrb[2].mxu0 %vm327_vm0, %v292_v11  ;;  %787 = vmatmul.mubr.msk.f32.gmra.mrb[2].mxu1 %vm327_vm0, %v300_v15 }
  0x19   : > { %416 = vmatprep.mubr.f32.mxu0 %v874_v0  ;;  %655 = vmatprep.mubr.f32.mxu1 %v874_v0 }
  0x1c   : > { %784 = vmatmul.mubr.msk.f32.gmra.mrb[4].mxu0 %vm327_vm0, %v293_v12 }
  0x1d   : > { %422 = vmatprep.mubr.f32.mxu0 %v874_v0 }
  0x20   : > { %785 = vmatmul.mubr.msk.f32.gmra.mrb[6].mxu0 %vm327_vm0, %v294_v13 }
  0x88   : > { %v310_v16 = vpop.permute.xlu0 %309  ;;  %v320_v28 = vpop.permute.xlu1 %319 }
  0x8c   : > { %v315_v22 = vpop.permute.xlu0 %314  ;;  %v325_v47 = vpop.permute.xlu1 %324 }
  0xe7   : > { %v406_v17 = vpop.f32.mrb[0].mxu0 }
  0xe8   : > { %v984_v18 = vadd.f32 %v406_v17, %v310_v16  ;;  %v408_v19 = vpop.f32.mrb[1].mxu0 }
  0xe9   : > { %v986_v20 = vadd.f32 %v408_v19, %v310_v16 }
  0xea   : > { %v429_v21 = vmul.f32 %v984_v18, %v984_v18 }
  0xeb   : > { %v430_v23 = vmul.f32 %v986_v20, %v986_v20  ;;  %v412_v24 = vpop.f32.mrb[2].mxu0 }
  0xec   : > { %v437_v25 = vmul.f32 %v429_v21, %v984_v18  ;;  %v993_v26 = vadd.f32 %v412_v24, %v315_v22  ;;  %v414_v27 = vpop.f32.mrb[3].mxu0 }
  0xed   : > { %v438_v29 = vmul.f32 %v430_v23, %v986_v20  ;;  %v996_v30 = vadd.f32 %v414_v27, %v315_v22 }
  0xee   : > { %v445_v31 = vmul.f32 0.044715, %v437_v25  ;;  %v431_v32 = vmul.f32 %v993_v26, %v993_v26 }
  0xef   : > { %v446_v33 = vmul.f32 0.044715, %v438_v29  ;;  %v432_v34 = vmul.f32 %v996_v30, %v996_v30  ;;  %v418_v35 = vpop.f32.mrb[4].mxu0 }
  0xf0   : > { %v453_v36 = vadd.f32 %v445_v31, %v984_v18  ;;  %v439_v37 = vmul.f32 %v431_v32, %v993_v26  ;;  %v1004_v38 = vadd.f32 %v418_v35, %v320_v28  ;;  %v420_v39 = vpop.f32.mrb[5].mxu0 }
  0xf1   : > { %v454_v40 = vadd.f32 %v446_v33, %v986_v20  ;;  %v440_v41 = vmul.f32 %v432_v34, %v996_v30  ;;  %v1008_v42 = vadd.f32 %v420_v39, %v320_v28 }
  0xf2   : > { %v461_v43 = vmul.f32 0.7978846, %v453_v36  ;;  %v447_v44 = vmul.f32 0.044715, %v439_v37  ;;  %v433_v45 = vmul.f32 %v1004_v38, %v1004_v38 }
  0xf3   : > { %v462_v46 = vmul.f32 0.7978846, %v454_v40  ;;  %v448_v48 = vmul.f32 0.044715, %v440_v41  ;;  %v434_v49 = vmul.f32 %v1008_v42, %v1008_v42  ;;  %v424_v50 = vpop.f32.mrb[6].mxu0 }
  0xf4   : > { %834 = vtanh.f32 %v461_v43  ;;  %v455_v51 = vadd.f32 %v447_v44, %v993_v26  ;;  %v441_v52 = vmul.f32 %v433_v45, %v1004_v38  ;;  %v1016_v53 = vadd.f32 %v424_v50, %v325_v47  ;;  %v426_v54 = vpop.f32.mrb[7].mxu0 }
  0xf5   : > { %836 = vtanh.f32 %v462_v46  ;;  %v456_v55 = vadd.f32 %v448_v48, %v996_v30  ;;  %v442_v56 = vmul.f32 %v434_v49, %v1008_v42  ;;  %v427_v57 = vadd.f32 %v426_v54, %v325_v47 }
  0xf6   : > { %v463_v58 = vmul.f32 0.7978846, %v455_v51  ;;  %v449_v59 = vmul.f32 0.044715, %v441_v52  ;;  %v435_v60 = vmul.f32 %v1016_v53, %v1016_v53  ;;  %v301_v51 = vld [vmem:[%s1057_s4] sm:$0xff] }
  0xf7   : > { %v464_v61 = vmul.f32 0.7978846, %v456_v55  ;;  %v450_v62 = vmul.f32 0.044715, %v442_v56  ;;  %v436_v63 = vmul.f32 %v427_v57, %v427_v57  ;;  %v676_v56 = vpop.permute.xlu1 %675 }
  0xf8   : > { %838 = vtanh.f32 %v463_v58  ;;  %v457_v1 = vadd.f32 %v449_v59, %v1004_v38  ;;  %v443_v2 = vmul.f32 %v435_v60, %v1016_v53 }
  0xf9   : > { %840 = vtanh.f32 %v464_v61  ;;  %v458_v3 = vadd.f32 %v450_v62, %v1008_v42  ;;  %v444_v4 = vmul.f32 %v436_v63, %v427_v57 }
  0xfa   : > { %v465_v5 = vmul.f32 0.7978846, %v457_v1  ;;  %v451_v6 = vmul.f32 0.044715, %v443_v2 }
  0xfb   : > { %v466_v7 = vmul.f32 0.7978846, %v458_v3  ;;  %v452_v8 = vmul.f32 0.044715, %v444_v4 }
  0xfc   : > { %842 = vtanh.f32 %v465_v5  ;;  %v459_v9 = vadd.f32 %v451_v6, %v1016_v53 }
  0xfd   : > { %844 = vtanh.f32 %v466_v7  ;;  %v460_v10 = vadd.f32 %v452_v8, %v427_v57 }
  0xfe   : > { %v835_v11 = vpop.eup %834  ;;  %v467_v12 = vmul.f32 0.7978846, %v459_v9 }
  0xff   : > { %v837_v13 = vpop.eup %836  ;;  %v477_v14 = vadd.f32 1.0, %v835_v11  ;;  %v468_v15 = vmul.f32 0.7978846, %v460_v10 }
 0x100   : > { %846 = vtanh.f32 %v467_v12  ;;  %v478_v16 = vadd.f32 1.0, %v837_v13 }
 0x101   : > { %848 = vtanh.f32 %v468_v15  ;;  %v485_v21 = vmul.f32 0.5, %v477_v14 }
 0x102   : > { %v839_v17 = vpop.eup %838  ;;  %v486_v24 = vmul.f32 0.5, %v478_v16 }
 0x103   : > { %v841_v19 = vpop.eup %840  ;;  %v479_v22 = vadd.f32 1.0, %v839_v17  ;;  %v493_v31 = vmul.f32 %v485_v21, %v984_v18 }
 0x104   : > { %v480_v23 = vadd.f32 1.0, %v841_v19  ;;  %v494_v34 = vmul.f32 %v486_v24, %v986_v20 }
 0x105   : > { %v487_v25 = vmul.f32 0.5, %v479_v22 }
 0x106   : > { %v843_v27 = vpop.eup %842  ;;  %v488_v28 = vmul.f32 0.5, %v480_v23 }
 0x107   : > { %v845_v29 = vpop.eup %844  ;;  %v495_v32 = vmul.f32 %v487_v25, %v993_v26  ;;  %v481_v33 = vadd.f32 1.0, %v843_v27 }
 0x108   : > { %v496_v35 = vmul.f32 %v488_v28, %v996_v30  ;;  %v482_v36 = vadd.f32 1.0, %v845_v29 }
 0x109   : > { %v796_v37 = vpack.c.bf16 %v495_v32, %v493_v31  ;;  %v489_v43 = vmul.f32 0.5, %v481_v33 }
 0x10a   : > { %v847_v39 = vpop.eup %846  ;;  %v794_v40 = vpack.c.bf16 %v496_v35, %v494_v34  ;;  %v490_v46 = vmul.f32 0.5, %v482_v36 }
 0x10b   : > { %v849_v41 = vpop.eup %848  ;;  %v483_v44 = vadd.f32 1.0, %v847_v39  ;;  %v497_v26 = vmul.f32 %v489_v43, %v1004_v38  ;;  %v302_v38 = vld [vmem:[%s1057_s4 + $0x8] sm:$0x3] }
 0x10c   : > { %795 = vmatprep.subr.bf16.mxu1 %v794_v40  ;;  %v484_v45 = vadd.f32 1.0, %v849_v41  ;;  %v498_v30 = vmul.f32 %v490_v46, %v1008_v42  ;;  %v671_v42 = vpop.permute.xlu0 %670 }
 0x10d   : > { %v491_v47 = vmul.f32 0.5, %v483_v44  ;;  %797 = vmatpush1.bf16.msra.mxu1 %v796_v37 }
 0x10e   : > { %v492_v18 = vmul.f32 0.5, %v484_v45 }
 0x10f   : > { %v499_v20 = vmul.f32 %v491_v47, %v1016_v53 }
 0x110   : > { %v500_v48 = vmul.f32 %v492_v18, %v427_v57 }
 0x111   : > { %v800_v49 = vpack.c.bf16 %v499_v20, %v497_v26 }
 0x112   : > { %v798_v50 = vpack.c.bf16 %v500_v48, %v498_v30 }
 0x114   : > { %799 = vmatprep.subr.bf16.mxu1 %v798_v50 }
 0x115   : > { %801 = vmatpush1.bf16.msra.mxu1 %v800_v49 }
 0x118   : > { %788 = vmatmul.mubr.msk.f32.vlgmr.msra.gmra.mrb[0].mxu1 %vm584_vm1, %v301_v51 }
 0x119   : > { %661 = vmatprep.mubr.f32.mxu1 %v874_v0 }
 0x11c   : > { %789 = vmatmul.mubr.msk.f32.gmra.mrb[2].mxu1 %vm584_vm1, %v302_v38 }
 0x1eb   : > { %v657_v52 = vpop.f32.mrb[0].mxu1 }
 0x1ec   : > { %v678_v53 = vadd.f32 %v671_v42, %v657_v52  ;;  %v659_v54 = vpop.f32.mrb[1].mxu1 }
 0x1ed   : > { %v679_v55 = vadd.f32 %v671_v42, %v659_v54 }
 0x1ee   : > { %682 = vst [vmem:[%s289_s16] sm:$0xff] %v678_v53 }
 0x1ef   : > { %683 = vst [vmem:[%s289_s16 + $0x8] sm:$0xff] %v679_v55  ;;  %v663_v57 = vpop.f32.mrb[2].mxu1 }
 0x1f0   : > { %v680_v0 = vadd.f32 %v676_v56, %v663_v57  ;;  %v665_v58 = vpop.f32.mrb[3].mxu1 }
 0x1f1   : > { %v681_v59 = vadd.f32 %v676_v56, %v665_v58 }
 0x1f2   : > { %684 = vst [vmem:[%s289_s16 + $0x10] sm:$0x3] %v680_v0 }
 0x1f3   : > { %685 = vst [vmem:[%s289_s16 + $0x18] sm:$0x3] %v681_v59 }
 0x1f4 PF: > { %s16_s23 = sadd.s32 1, %s872_s23   ;;  %s1060_s21 = smov %s868_s22 }
 0x1f5   : > { %p13_p5 = scmp.ge.s32.totalorder %s16_s23, 4   ;;  %s1061_s22 = smov %s1063_s24 }
 0x1f7   :  { %15 = sbr.rel (!%p13_p5) target bundleno = 2 (0x2), region = 74 }

</bundles_post_ra>
